<compile_context>
chip_gen: v7x
topology: tpu7x:2x2x1
jax: 0.10.0
libtpu: 0.0.40
codegen_flags: <defaults>
</compile_context>

<pallas_src>
import functools
import math

import jax
import jax.numpy as jnp
from jax.experimental import pallas as pl
from jax.experimental.pallas import tpu as pltpu


def _mha_kernel(q_ref, k_ref, wq_ref, wkv_ref, o_ref, *, num_heads):
    """One grid step processes B batch elements.

    q_ref  : [B, T_q, Dq]
    k_ref  : [B, T_k, Dk]
    wq_ref : [Dq, U]   (1/sqrt(key_dim) already folded in)
    wkv_ref: [Dk, 2U]  (W_key | W_value concatenated along the output dim)
    o_ref  : [B, T_q, U]
    """
    B, T_q, Dq = q_ref.shape
    _, T_k, Dk = k_ref.shape
    U = wq_ref.shape[1]
    d = U // num_heads

    # ---- Projections: fold batch into the matmul M dim (one big matmul per
    # weight instead of 3*B skinny ones).  fp32 accumulation on the MXU.
    q2 = q_ref[...].reshape(B * T_q, Dq)
    k2 = k_ref[...].reshape(B * T_k, Dk)

    Q = jnp.dot(q2, wq_ref[...], preferred_element_type=jnp.float32)    # [B*T_q, U]
    KV = jnp.dot(k2, wkv_ref[...], preferred_element_type=jnp.float32)  # [B*T_k, 2U]

    Q3 = Q.reshape(B, T_q, U)
    K3 = KV[:, :U].reshape(B, T_k, U)
    V3 = KV[:, U:].reshape(B, T_k, U)

    # ---- Attention: static unroll over heads; batched over B with a single
    # leading batch dim so each einsum is one batched MXU contraction.
    outs = []
    for h in range(num_heads):
        sl = slice(h * d, (h + 1) * d)
        Qh = Q3[:, :, sl]                                   # [B, T_q, d]
        Kh = K3[:, :, sl]                                   # [B, T_k, d]
        Vh = V3[:, :, sl]                                   # [B, T_k, d]

        s = jnp.einsum('bqd,bkd->bqk', Qh, Kh,
                       preferred_element_type=jnp.float32)  # [B, T_q, T_k]

        # f32 softmax (unnormalized): max / exp / sum stay in f32 on all chips.
        m = jnp.max(s, axis=-1, keepdims=True)
        p = jnp.exp(s - m)
        l = jnp.sum(p, axis=-1, keepdims=True)              # [B, T_q, 1]

        pv = jnp.einsum('bqk,bkd->bqd', p, Vh,
                        preferred_element_type=jnp.float32)  # [B, T_q, d]
        # Deferred normalization on the small PV output (EUP reciprocal).
        outs.append(pv * pl.reciprocal(l, approx=False))

    out = jnp.concatenate(outs, axis=-1)                    # [B, T_q, U]
    o_ref[...] = out.astype(o_ref.dtype)


def multi_head_attention(query, key, wq, wk, wv, *, num_heads, key_dim,
                         batch_block=8):
    """query [N,T_q,Dq], key [N,T_k,Dk]; wq [Dq,U], wk/wv [Dk,U] -> [N,T_q,U]."""
    N, T_q, Dq = query.shape
    _, T_k, Dk = key.shape
    U = wq.shape[1]
    assert U % num_heads == 0

    # Largest batch block <= batch_block that divides N (keeps the grid even
    # for v7x's 2 TensorCores when N allows it).
    B = next(b for b in range(min(batch_block, N), 0, -1) if N % b == 0)

    # Fold the 1/sqrt(key_dim) score scale into W_query and fuse the key-side
    # weights into one [Dk, 2U] matrix (both done once, outside the kernel).
    scale = 1.0 / math.sqrt(float(key_dim))
    wq_scaled = (wq * scale).astype(wq.dtype)
    wkv = jnp.concatenate([wk, wv], axis=1)

    kernel = functools.partial(_mha_kernel, num_heads=num_heads)

    return pl.pallas_call(
        kernel,
        out_shape=jax.ShapeDtypeStruct((N, T_q, U), query.dtype),
        grid=(N // B,),
        in_specs=[
            pl.BlockSpec((B, T_q, Dq), lambda n: (n, 0, 0)),
            pl.BlockSpec((B, T_k, Dk), lambda n: (n, 0, 0)),
            pl.BlockSpec((Dq, U), lambda n: (0, 0)),       # weights: constant block
            pl.BlockSpec((Dk, 2 * U), lambda n: (0, 0)),   # -> VMEM-resident
        ],
        out_specs=pl.BlockSpec((B, T_q, U), lambda n: (n, 0, 0)),
        compiler_params=pltpu.CompilerParams(
            dimension_semantics=("parallel",)),
    )(query, key, wq_scaled, wkv)


def _reference(query, key, wq, wk, wv, *, num_heads, key_dim):
    """Pure-JAX reference mirroring the torch forward exactly."""
    Q = query @ wq                       # [N, T_q, U]
    K = key @ wk                         # [N, T_k, U]
    V = key @ wv                         # [N, T_k, U]
    Qh = jnp.stack(jnp.split(Q, num_heads, axis=2), axis=0)
    Kh = jnp.stack(jnp.split(K, num_heads, axis=2), axis=0)
    Vh = jnp.stack(jnp.split(V, num_heads, axis=2), axis=0)
    scores = jnp.einsum('hnqd,hnkd->hnqk', Qh, Kh) / (key_dim ** 0.5)
    scores = jax.nn.softmax(scores, axis=3)
    out = jnp.einsum('hnqk,hnkd->hnqd', scores, Vh)     # [h, N, T_q, d]
    out = jnp.concatenate(jnp.split(out, num_heads, axis=0), axis=3)[0]
    return out


if __name__ == "__main__":
    # Small shapes consistent with the module.
    N, T_q, T_k = 2, 8, 16
    query_dim, key_dim, num_units, num_heads = 32, 32, 32, 4

    root = jax.random.PRNGKey(0)
    kq, kk, k1, k2, k3 = jax.random.split(root, 5)

    query = jax.random.normal(kq, (N, T_q, query_dim), dtype=jnp.float32)
    key = jax.random.normal(kk, (N, T_k, key_dim), dtype=jnp.float32)

    # Deterministic "Linear(bias=False)" weights, stored as [in, out] (= W.T).
    wq = jax.random.normal(k1, (query_dim, num_units), dtype=jnp.float32) * 0.1
    wk = jax.random.normal(k2, (key_dim, num_units), dtype=jnp.float32) * 0.1
    wv = jax.random.normal(k3, (key_dim, num_units), dtype=jnp.float32) * 0.1

    out = multi_head_attention(query, key, wq, wk, wv,
                               num_heads=num_heads, key_dim=key_dim)
    out = jax.block_until_ready(out)

    ref = _reference(query, key, wq, wk, wv,
                     num_heads=num_heads, key_dim=key_dim)

    assert out.shape == (N, T_q, num_units)
    assert jnp.allclose(out, ref, atol=1e-5, rtol=1e-5), "mismatch vs reference"
    print("KERNEL_OK")
</pallas_src>

<mosaic_0001>
module attributes {stable_mosaic.version = 11 : i64} {
  func.func @_mha_kernel(%arg0: i32, %arg1: memref<2x8x32xf32, #tpu.memory_space<vmem>>, %arg2: memref<2x16x32xf32, #tpu.memory_space<vmem>>, %arg3: memref<32x32xf32, #tpu.memory_space<vmem>>, %arg4: memref<32x64xf32, #tpu.memory_space<vmem>>, %arg5: memref<2x8x32xf32, #tpu.memory_space<vmem>>) attributes {dimension_semantics = [#tpu.dimension_semantics<parallel>], iteration_bounds = array<i64: 1>, scalar_prefetch = 0 : i64, scratch_operands = 0 : i64, tpu.core_type = #tpu.core_type<tc>, window_params = [{transform_indices = @transform_0, window_bounds = array<i64: 2, 8, 32>}, {transform_indices = @transform_1, window_bounds = array<i64: 2, 16, 32>}, {pipeline_mode = #tpu.pipeline_mode<synchronous>, transform_indices = @transform_2, window_bounds = array<i64: 32, 32>}, {pipeline_mode = #tpu.pipeline_mode<synchronous>, transform_indices = @transform_3, window_bounds = array<i64: 32, 64>}, {transform_indices = @transform_4, window_bounds = array<i64: 2, 8, 32>}]} {
    %c0 = arith.constant 0 : index
    %c0_0 = arith.constant 0 : index
    %c0_1 = arith.constant 0 : index
    %0 = vector.load %arg1[%c0, %c0_0, %c0_1] : memref<2x8x32xf32, #tpu.memory_space<vmem>>, vector<2x8x32xf32>
    %1 = vector.shape_cast %0 : vector<2x8x32xf32> to vector<16x32xf32>
    %c0_2 = arith.constant 0 : index
    %c0_3 = arith.constant 0 : index
    %c0_4 = arith.constant 0 : index
    %2 = vector.load %arg2[%c0_2, %c0_3, %c0_4] : memref<2x16x32xf32, #tpu.memory_space<vmem>>, vector<2x16x32xf32>
    %3 = vector.shape_cast %2 : vector<2x16x32xf32> to vector<32x32xf32>
    %c0_5 = arith.constant 0 : index
    %c0_6 = arith.constant 0 : index
    %4 = vector.load %arg3[%c0_5, %c0_6] : memref<32x32xf32, #tpu.memory_space<vmem>>, vector<32x32xf32>
    %cst = arith.constant dense<0.000000e+00> : vector<16x32xf32>
    %5 = tpu.matmul %1, %4, %cst {dimension_numbers = #tpu.dot_dimension_numbers<[1], [0], [0], [1], [0, 0, 1, 1], [], []>} : vector<16x32xf32>, vector<32x32xf32>, vector<16x32xf32> -> vector<16x32xf32>
    %c0_7 = arith.constant 0 : index
    %c0_8 = arith.constant 0 : index
    %6 = vector.load %arg4[%c0_7, %c0_8] : memref<32x64xf32, #tpu.memory_space<vmem>>, vector<32x64xf32>
    %cst_9 = arith.constant dense<0.000000e+00> : vector<32x64xf32>
    %7 = tpu.matmul %3, %6, %cst_9 {dimension_numbers = #tpu.dot_dimension_numbers<[1], [0], [0], [1], [0, 0, 1, 1], [], []>} : vector<32x32xf32>, vector<32x64xf32>, vector<32x64xf32> -> vector<32x64xf32>
    %8 = vector.shape_cast %5 : vector<16x32xf32> to vector<2x8x32xf32>
    %9 = vector.extract_strided_slice %7 {offsets = [0, 0], sizes = [32, 32], strides = [1, 1]} : vector<32x64xf32> to vector<32x32xf32>
    %10 = vector.shape_cast %9 : vector<32x32xf32> to vector<2x16x32xf32>
    %11 = vector.extract_strided_slice %7 {offsets = [0, 32], sizes = [32, 32], strides = [1, 1]} : vector<32x64xf32> to vector<32x32xf32>
    %12 = vector.shape_cast %11 : vector<32x32xf32> to vector<2x16x32xf32>
    %13 = vector.extract_strided_slice %8 {offsets = [0, 0, 0], sizes = [2, 8, 8], strides = [1, 1, 1]} : vector<2x8x32xf32> to vector<2x8x8xf32>
    %14 = vector.extract_strided_slice %10 {offsets = [0, 0, 0], sizes = [2, 16, 8], strides = [1, 1, 1]} : vector<2x16x32xf32> to vector<2x16x8xf32>
    %15 = vector.extract_strided_slice %12 {offsets = [0, 0, 0], sizes = [2, 16, 8], strides = [1, 1, 1]} : vector<2x16x32xf32> to vector<2x16x8xf32>
    "tpu.trace_start"() <{level = 10 : i32, message = "bqd,bkd->bqk"}> : () -> ()
    %cst_10 = arith.constant dense<0.000000e+00> : vector<2x8x16xf32>
    %16 = tpu.matmul %13, %14, %cst_10 {dimension_numbers = #tpu.dot_dimension_numbers<[2], [2], [1], [1], [0, 0, 0, 1, 1, 1], [0], [0]>} : vector<2x8x8xf32>, vector<2x16x8xf32>, vector<2x8x16xf32> -> vector<2x8x16xf32>
    "tpu.trace_stop"() : () -> ()
    %cst_11 = arith.constant dense<0xFF800000> : vector<2x8xf32>
    %17 = vector.multi_reduction <maximumf>, %16, %cst_11 [2] : vector<2x8x16xf32> to vector<2x8xf32>
    %18 = vector.shape_cast %17 : vector<2x8xf32> to vector<2x8x1xf32>
    %19 = vector.broadcast %18 : vector<2x8x1xf32> to vector<2x8x16xf32>
    %20 = arith.subf %16, %19 : vector<2x8x16xf32>
    %21 = math.exp %20 : vector<2x8x16xf32>
    %cst_12 = arith.constant dense<0.000000e+00> : vector<2x8xf32>
    %22 = vector.multi_reduction <add>, %21, %cst_12 [2] : vector<2x8x16xf32> to vector<2x8xf32>
    %23 = vector.shape_cast %22 : vector<2x8xf32> to vector<2x8x1xf32>
    "tpu.trace_start"() <{level = 10 : i32, message = "bqk,bkd->bqd"}> : () -> ()
    %cst_13 = arith.constant dense<0.000000e+00> : vector<2x8x8xf32>
    %24 = tpu.matmul %21, %15, %cst_13 {dimension_numbers = #tpu.dot_dimension_numbers<[2], [1], [1], [2], [0, 0, 0, 1, 1, 2], [0], [0]>} : vector<2x8x16xf32>, vector<2x16x8xf32>, vector<2x8x8xf32> -> vector<2x8x8xf32>
    "tpu.trace_stop"() : () -> ()
    %25 = tpu.reciprocal %23 : vector<2x8x1xf32> -> vector<2x8x1xf32>
    %26 = vector.broadcast %25 : vector<2x8x1xf32> to vector<2x8x8xf32>
    %27 = arith.mulf %24, %26 : vector<2x8x8xf32>
    %28 = vector.extract_strided_slice %8 {offsets = [0, 0, 8], sizes = [2, 8, 8], strides = [1, 1, 1]} : vector<2x8x32xf32> to vector<2x8x8xf32>
    %29 = vector.extract_strided_slice %10 {offsets = [0, 0, 8], sizes = [2, 16, 8], strides = [1, 1, 1]} : vector<2x16x32xf32> to vector<2x16x8xf32>
    %30 = vector.extract_strided_slice %12 {offsets = [0, 0, 8], sizes = [2, 16, 8], strides = [1, 1, 1]} : vector<2x16x32xf32> to vector<2x16x8xf32>
    "tpu.trace_start"() <{level = 10 : i32, message = "bqd,bkd->bqk"}> : () -> ()
    %cst_14 = arith.constant dense<0.000000e+00> : vector<2x8x16xf32>
    %31 = tpu.matmul %28, %29, %cst_14 {dimension_numbers = #tpu.dot_dimension_numbers<[2], [2], [1], [1], [0, 0, 0, 1, 1, 1], [0], [0]>} : vector<2x8x8xf32>, vector<2x16x8xf32>, vector<2x8x16xf32> -> vector<2x8x16xf32>
    "tpu.trace_stop"() : () -> ()
    %cst_15 = arith.constant dense<0xFF800000> : vector<2x8xf32>
    %32 = vector.multi_reduction <maximumf>, %31, %cst_15 [2] : vector<2x8x16xf32> to vector<2x8xf32>
    %33 = vector.shape_cast %32 : vector<2x8xf32> to vector<2x8x1xf32>
    %34 = vector.broadcast %33 : vector<2x8x1xf32> to vector<2x8x16xf32>
    %35 = arith.subf %31, %34 : vector<2x8x16xf32>
    %36 = math.exp %35 : vector<2x8x16xf32>
    %cst_16 = arith.constant dense<0.000000e+00> : vector<2x8xf32>
    %37 = vector.multi_reduction <add>, %36, %cst_16 [2] : vector<2x8x16xf32> to vector<2x8xf32>
    %38 = vector.shape_cast %37 : vector<2x8xf32> to vector<2x8x1xf32>
    "tpu.trace_start"() <{level = 10 : i32, message = "bqk,bkd->bqd"}> : () -> ()
    %cst_17 = arith.constant dense<0.000000e+00> : vector<2x8x8xf32>
    %39 = tpu.matmul %36, %30, %cst_17 {dimension_numbers = #tpu.dot_dimension_numbers<[2], [1], [1], [2], [0, 0, 0, 1, 1, 2], [0], [0]>} : vector<2x8x16xf32>, vector<2x16x8xf32>, vector<2x8x8xf32> -> vector<2x8x8xf32>
    "tpu.trace_stop"() : () -> ()
    %40 = tpu.reciprocal %38 : vector<2x8x1xf32> -> vector<2x8x1xf32>
    %41 = vector.broadcast %40 : vector<2x8x1xf32> to vector<2x8x8xf32>
    %42 = arith.mulf %39, %41 : vector<2x8x8xf32>
    %43 = vector.extract_strided_slice %8 {offsets = [0, 0, 16], sizes = [2, 8, 8], strides = [1, 1, 1]} : vector<2x8x32xf32> to vector<2x8x8xf32>
    %44 = vector.extract_strided_slice %10 {offsets = [0, 0, 16], sizes = [2, 16, 8], strides = [1, 1, 1]} : vector<2x16x32xf32> to vector<2x16x8xf32>
    %45 = vector.extract_strided_slice %12 {offsets = [0, 0, 16], sizes = [2, 16, 8], strides = [1, 1, 1]} : vector<2x16x32xf32> to vector<2x16x8xf32>
    "tpu.trace_start"() <{level = 10 : i32, message = "bqd,bkd->bqk"}> : () -> ()
    %cst_18 = arith.constant dense<0.000000e+00> : vector<2x8x16xf32>
    %46 = tpu.matmul %43, %44, %cst_18 {dimension_numbers = #tpu.dot_dimension_numbers<[2], [2], [1], [1], [0, 0, 0, 1, 1, 1], [0], [0]>} : vector<2x8x8xf32>, vector<2x16x8xf32>, vector<2x8x16xf32> -> vector<2x8x16xf32>
    "tpu.trace_stop"() : () -> ()
    %cst_19 = arith.constant dense<0xFF800000> : vector<2x8xf32>
    %47 = vector.multi_reduction <maximumf>, %46, %cst_19 [2] : vector<2x8x16xf32> to vector<2x8xf32>
    %48 = vector.shape_cast %47 : vector<2x8xf32> to vector<2x8x1xf32>
    %49 = vector.broadcast %48 : vector<2x8x1xf32> to vector<2x8x16xf32>
    %50 = arith.subf %46, %49 : vector<2x8x16xf32>
    %51 = math.exp %50 : vector<2x8x16xf32>
    %cst_20 = arith.constant dense<0.000000e+00> : vector<2x8xf32>
    %52 = vector.multi_reduction <add>, %51, %cst_20 [2] : vector<2x8x16xf32> to vector<2x8xf32>
    %53 = vector.shape_cast %52 : vector<2x8xf32> to vector<2x8x1xf32>
    "tpu.trace_start"() <{level = 10 : i32, message = "bqk,bkd->bqd"}> : () -> ()
    %cst_21 = arith.constant dense<0.000000e+00> : vector<2x8x8xf32>
    %54 = tpu.matmul %51, %45, %cst_21 {dimension_numbers = #tpu.dot_dimension_numbers<[2], [1], [1], [2], [0, 0, 0, 1, 1, 2], [0], [0]>} : vector<2x8x16xf32>, vector<2x16x8xf32>, vector<2x8x8xf32> -> vector<2x8x8xf32>
    "tpu.trace_stop"() : () -> ()
    %55 = tpu.reciprocal %53 : vector<2x8x1xf32> -> vector<2x8x1xf32>
    %56 = vector.broadcast %55 : vector<2x8x1xf32> to vector<2x8x8xf32>
    %57 = arith.mulf %54, %56 : vector<2x8x8xf32>
    %58 = vector.extract_strided_slice %8 {offsets = [0, 0, 24], sizes = [2, 8, 8], strides = [1, 1, 1]} : vector<2x8x32xf32> to vector<2x8x8xf32>
    %59 = vector.extract_strided_slice %10 {offsets = [0, 0, 24], sizes = [2, 16, 8], strides = [1, 1, 1]} : vector<2x16x32xf32> to vector<2x16x8xf32>
    %60 = vector.extract_strided_slice %12 {offsets = [0, 0, 24], sizes = [2, 16, 8], strides = [1, 1, 1]} : vector<2x16x32xf32> to vector<2x16x8xf32>
    "tpu.trace_start"() <{level = 10 : i32, message = "bqd,bkd->bqk"}> : () -> ()
    %cst_22 = arith.constant dense<0.000000e+00> : vector<2x8x16xf32>
    %61 = tpu.matmul %58, %59, %cst_22 {dimension_numbers = #tpu.dot_dimension_numbers<[2], [2], [1], [1], [0, 0, 0, 1, 1, 1], [0], [0]>} : vector<2x8x8xf32>, vector<2x16x8xf32>, vector<2x8x16xf32> -> vector<2x8x16xf32>
    "tpu.trace_stop"() : () -> ()
    %cst_23 = arith.constant dense<0xFF800000> : vector<2x8xf32>
    %62 = vector.multi_reduction <maximumf>, %61, %cst_23 [2] : vector<2x8x16xf32> to vector<2x8xf32>
    %63 = vector.shape_cast %62 : vector<2x8xf32> to vector<2x8x1xf32>
    %64 = vector.broadcast %63 : vector<2x8x1xf32> to vector<2x8x16xf32>
    %65 = arith.subf %61, %64 : vector<2x8x16xf32>
    %66 = math.exp %65 : vector<2x8x16xf32>
    %cst_24 = arith.constant dense<0.000000e+00> : vector<2x8xf32>
    %67 = vector.multi_reduction <add>, %66, %cst_24 [2] : vector<2x8x16xf32> to vector<2x8xf32>
    %68 = vector.shape_cast %67 : vector<2x8xf32> to vector<2x8x1xf32>
    "tpu.trace_start"() <{level = 10 : i32, message = "bqk,bkd->bqd"}> : () -> ()
    %cst_25 = arith.constant dense<0.000000e+00> : vector<2x8x8xf32>
    %69 = tpu.matmul %66, %60, %cst_25 {dimension_numbers = #tpu.dot_dimension_numbers<[2], [1], [1], [2], [0, 0, 0, 1, 1, 2], [0], [0]>} : vector<2x8x16xf32>, vector<2x16x8xf32>, vector<2x8x8xf32> -> vector<2x8x8xf32>
    "tpu.trace_stop"() : () -> ()
    %70 = tpu.reciprocal %68 : vector<2x8x1xf32> -> vector<2x8x1xf32>
    %71 = vector.broadcast %70 : vector<2x8x1xf32> to vector<2x8x8xf32>
    %72 = arith.mulf %69, %71 : vector<2x8x8xf32>
    %73 = tpu.concatenate %27, %42, %57, %72 in 2 : vector<2x8x8xf32>, vector<2x8x8xf32>, vector<2x8x8xf32>, vector<2x8x8xf32> -> vector<2x8x32xf32>
    %c0_26 = arith.constant 0 : index
    %c0_27 = arith.constant 0 : index
    %c0_28 = arith.constant 0 : index
    %74 = vector.load %arg5[%c0_26, %c0_27, %c0_28] : memref<2x8x32xf32, #tpu.memory_space<vmem>>, vector<2x8x32xf32>
    tpu.vector_store %arg5[%c0_26, %c0_27, %c0_28], %73 {strides = array<i32>} : memref<2x8x32xf32, #tpu.memory_space<vmem>>, vector<2x8x32xf32>,
    return
  }
  func.func @transform_0(%arg0: i32) -> (i32, i32, i32) {
    %c0_i32 = arith.constant 0 : i32
    %c0_i32_0 = arith.constant 0 : i32
    %c0_i32_1 = arith.constant 0 : i32
    return %arg0, %c0_i32, %c0_i32_0 : i32, i32, i32
  }
  func.func @transform_1(%arg0: i32) -> (i32, i32, i32) {
    %c0_i32 = arith.constant 0 : i32
    %c0_i32_0 = arith.constant 0 : i32
    %c0_i32_1 = arith.constant 0 : i32
    return %arg0, %c0_i32, %c0_i32_0 : i32, i32, i32
  }
  func.func @transform_2(%arg0: i32) -> (i32, i32) {
    %c0_i32 = arith.constant 0 : i32
    %c0_i32_0 = arith.constant 0 : i32
    %c0_i32_1 = arith.constant 0 : i32
    return %c0_i32, %c0_i32_0 : i32, i32
  }
  func.func @transform_3(%arg0: i32) -> (i32, i32) {
    %c0_i32 = arith.constant 0 : i32
    %c0_i32_0 = arith.constant 0 : i32
    %c0_i32_1 = arith.constant 0 : i32
    return %c0_i32, %c0_i32_0 : i32, i32
  }
  func.func @transform_4(%arg0: i32) -> (i32, i32, i32) {
    %c0_i32 = arith.constant 0 : i32
    %c0_i32_0 = arith.constant 0 : i32
    %c0_i32_1 = arith.constant 0 : i32
    return %arg0, %c0_i32, %c0_i32_0 : i32, i32, i32
  }
}

</mosaic_0001>

<bundles_post_ra>
// kernel: tpu_custom_call.1
= control target key start
LH: loop header
LB: loop body
LE: loop exit
PB: predicated region body
PF: predicated region fallthrough
CT: control target
= control target key end

     0   :  { %9 = vsyncpa [#allocation3], 0  ;;  %s2557_s0 = inlined_call_operand.hbm [shape: f32[2,8,32], index: 0, kind: input, shape index: {}]   ;;  %s2558_s1 = inlined_call_operand.hbm [shape: f32[2,16,32], index: 1, kind: input, shape index: {}]   ;;  %s2559_s2 = inlined_call_operand.hbm [shape: f32[32,32], index: 2, kind: input, shape index: {}]   ;;  %s2560_s3 = inlined_call_operand.hbm [shape: f32[32,64], index: 3, kind: input, shape index: {}]   ;;  %s2561_s4 = inlined_call_operand.hbm [shape: f32[2,8,32], index: 4, kind: output, shape index: {}]  }
   0x1   :  { %10 = vsyncpa [#allocation6], 0 }
   0x2   :  { %11 = vsyncpa [#allocation9], 0 }
   0x3   :  { %12 = vsyncpa [#allocation4], 0  ;;  %s2238_s15 = smov [#allocation5]   ;;  %s2239_s17 = smov [#allocation2]  }
   0x4   :  { %s30_s16 = sshll.u32 %s2238_s15, 4  ;;  %s18_s18 = sshll.u32 %s2239_s17, 4  ;;  %s31_s16 = int_to_ptr.vmem [resolvable:$true] %s30_s16  ;;  %s2282_s18 = int_to_ptr.vmem [resolvable:$true] %s18_s18 }
   0x5   :  { %s2120_s21 = scalar_lea.hbm %s2558_s1, 512 }
   0x6   :  { %p2121_p0 = scmp.ne.s32.totalorder %s2558_s1, %s2120_s21  ;;  %p2124_p1 = scmp.lt.u32.totalorder %s2120_s21, %s2558_s1 }
   0x8   :  { %p2126_p2 = pnand %p2124_p1, %p2121_p0 }
   0xa   :  { %2129 = shalt.err (!%p2126_p2)
}
   0xb   :  { %s2130_s26 = scalar_lea.vmem %s31_s16, 512  ;;  %p2135_p4 = scmp.lt.s32.totalorder %s31_s16, %s31_s16 }
   0xc   :  { %p2131_p3 = scmp.ne.s32.totalorder %s31_s16, %s2130_s26  ;;  %p2136_p5 = scmp.lt.s32.totalorder %s2130_s26, %s2130_s26 }
   0xe   :  { %p2137_p6 = por %p2136_p5, %p2135_p4 }
  0x10   :  { %p2138_p7 = pnand %p2137_p6, %p2131_p3 }
  0x12   :  { %2141 = shalt.err (!%p2138_p7)
}
  0x13   :  { %s2240_s27 = smov 128   ;;  %s2241_s28 = smov 8  }
  0x14   :  { %36 = dma.hbm_to_vmem [thread:$0]  %s2558_s1, 512, %s31_s16, [#allocation6], %s2240_s27, %s2240_s27, %s2241_s28  }
  0x15   :  { %s2142_s7 = scalar_lea.hbm %s2557_s0, 256 }
  0x16   :  { %p2143_p8 = scmp.ne.s32.totalorder %s2557_s0, %s2142_s7  ;;  %p2146_p9 = scmp.lt.u32.totalorder %s2142_s7, %s2557_s0 }
  0x18   :  { %p2148_p10 = pnand %p2146_p9, %p2143_p8 }
  0x1a   :  { %2151 = shalt.err (!%p2148_p10)
}
  0x1b   :  { %s2152_s12 = scalar_lea.vmem %s2282_s18, 256  ;;  %p2157_p12 = scmp.lt.s32.totalorder %s2282_s18, %s2282_s18 }
  0x1c   :  { %p2153_p11 = scmp.ne.s32.totalorder %s2282_s18, %s2152_s12  ;;  %p2158_p13 = scmp.lt.s32.totalorder %s2152_s12, %s2152_s12 }
  0x1e   :  { %p2159_p0 = por %p2158_p13, %p2157_p12 }
  0x20   :  { %p2160_p1 = pnand %p2159_p0, %p2153_p11 }
  0x22   :  { %2163 = shalt.err (!%p2160_p1)
}
  0x23   :  { %24 = dma.hbm_to_vmem [thread:$0]  %s2557_s0, 256, %s2282_s18, [#allocation3], %s2240_s27, %s2240_s27, %s2241_s28  }
  0x24   :  { %s2242_s14 = smov [#allocation7]   ;;  %s2243_s16 = smov [#allocation8]  }
  0x25   :  { %s42_s15 = sshll.u32 %s2242_s14, 4  ;;  %s54_s17 = sshll.u32 %s2243_s16, 4  ;;  %s43_s15 = int_to_ptr.vmem [resolvable:$true] %s42_s15  ;;  %s2319_s17 = int_to_ptr.vmem [resolvable:$true] %s54_s17 }
  0x26   :  { %s2164_s21 = scalar_lea.hbm %s2559_s2, 512 }
  0x27   :  { %p2165_p2 = scmp.ne.s32.totalorder %s2559_s2, %s2164_s21  ;;  %p2168_p3 = scmp.lt.u32.totalorder %s2164_s21, %s2559_s2 }
  0x29   :  { %p2170_p4 = pnand %p2168_p3, %p2165_p2 }
  0x2b   :  { %2173 = shalt.err (!%p2170_p4)
}
  0x2c   :  { %s2174_s0 = scalar_lea.vmem %s43_s15, 512  ;;  %p2179_p6 = scmp.lt.s32.totalorder %s43_s15, %s43_s15 }
  0x2d   :  { %p2175_p5 = scmp.ne.s32.totalorder %s43_s15, %s2174_s0  ;;  %p2180_p7 = scmp.lt.s32.totalorder %s2174_s0, %s2174_s0 }
  0x2f   :  { %p2181_p8 = por %p2180_p7, %p2179_p6 }
  0x31   :  { %p2182_p9 = pnand %p2181_p8, %p2175_p5 }
  0x33   :  { %2185 = shalt.err (!%p2182_p9)
}
  0x34   :  { %48 = dma.hbm_to_vmem [thread:$0]  %s2559_s2, 512, %s43_s15, [#allocation6], %s2240_s27, %s2240_s27, %s2241_s28  }
  0x35   :  { %s2186_s5 = scalar_lea.hbm %s2560_s3, 512 }
  0x36   :  { %p2187_p10 = scmp.ne.s32.totalorder %s2560_s3, %s2186_s5  ;;  %p2190_p11 = scmp.lt.u32.totalorder %s2186_s5, %s2560_s3 }
  0x38   :  { %p2192_p12 = pnand %p2190_p11, %p2187_p10 }
  0x3a   :  { %2195 = shalt.err (!%p2192_p12)
}
  0x3b   :  { %s2196_s10 = scalar_lea.vmem %s2319_s17, 512  ;;  %p2201_p0 = scmp.lt.s32.totalorder %s2319_s17, %s2319_s17 }
  0x3c   :  { %p2197_p13 = scmp.ne.s32.totalorder %s2319_s17, %s2196_s10  ;;  %p2202_p1 = scmp.lt.s32.totalorder %s2196_s10, %s2196_s10 }
  0x3e   :  { %p2203_p2 = por %p2202_p1, %p2201_p0 }
  0x40   :  { %p2204_p3 = pnand %p2203_p2, %p2197_p13 }
  0x42   :  { %2207 = shalt.err (!%p2204_p3)
}
  0x43   :  { %60 = dma.hbm_to_vmem [thread:$0]  %s2560_s3, 512, %s2319_s17, [#allocation9], %s2240_s27, %s2240_s27, %s2241_s28  }
  0x44   :  { %2230 = dma.done.wait [#allocation3], 256  }
  0x45   :  { %2231 = vsyncadd [#allocation3], 4294967040 }
  0x46   :  { %2232 = dma.done.wait [#allocation6], 1024  }
  0x47   :  { %2233 = vsyncadd [#allocation6], 4294966272 }
  0x48   :  { %2234 = dma.done.wait [#allocation9], 512  }
  0x49   :  { %2235 = vsyncadd [#allocation9], 4294966784  ;;  %vm83_vm0 = vcmask 261120   ;;  %v165_v0 = vld [vmem:[#allocation8] sm:$0xff]  ;;  %v166_v1 = vld [vmem:[#allocation8 + $0x8] sm:$0xff]  ;;  %v2244_v18 = vmov 0.0|0.0  }
  0x4a   :  { %v167_v2 = vld [vmem:[#allocation8 + $0x10] sm:$0xff]  ;;  %v1935_v3 = vpack.c.bf16 %v166_v1, %v165_v0  ;;  %v168_v4 = vld [vmem:[#allocation8 + $0x18] sm:$0xff]  ;;  %v75_v5 = vld [vmem:[#allocation5] sm:$0xff]  ;;  %vm2245_vm1 = vmmov 0   ;;  %v2246_v19 = vmov 0.0   ;;  %vm266_vm2 = vcmask 64512  }
  0x4b   :  { %v1939_v6 = vpack.c.bf16 %v168_v4, %v167_v2  ;;  %1809 = vmatprep.mubr.msk.f32.mxu1 %vm83_vm0, %v75_v5  ;;  %v79_v7 = vld [vmem:[#allocation7] sm:$0xff]  ;;  %v80_v8 = vld [vmem:[#allocation7 + $0x8] sm:$0xff]  ;;  %v81_v10 = vld [vmem:[#allocation7 + $0x10] sm:$0xff]  ;;  %s2247_s3 = smov 96   ;;  %s2248_s12 = smov 120   ;;  %vm425_vm4 = vcmask 130048  }
  0x4c   :  { %1936 = vmatprep.subr.bf16.mxu1 %v1935_v3  ;;  %v1927_v9 = vpack.c.bf16 %v80_v8, %v79_v7  ;;  %v82_v11 = vld [vmem:[#allocation7 + $0x18] sm:$0xff]  ;;  %v73_v13 = vld [vmem:[#allocation2] sm:$0xff]  ;;  %v76_v14 = vld [vmem:[#allocation5 + $0x8] sm:$0xff]  ;;  %s2249_s1 = smov 88   ;;  %s2250_s13 = smov 112   ;;  %vm1666_vm5 = vcmask 195584  }
  0x4d   :  { %1938 = vmatpush3.bf16.msra.mxu1 %v1935_v3  ;;  %v1931_v12 = vpack.c.bf16 %v82_v11, %v81_v10  ;;  %1798 = vmatprep.mubr.msk.f32.mxu0 %vm83_vm0, %v73_v13  ;;  %v77_v15 = vld [vmem:[#allocation5 + $0x10] sm:$0xff]  ;;  %v74_v16 = vld [vmem:[#allocation2 + $0x8] sm:$0xff]  ;;  %vm2370_vm3 = vmpackc.low %vm266_vm2, %vm266_vm2  ;;  %s2251_s14 = smov 80   ;;  %s2252_s15 = smov 104  }
  0x4e   :  { %1940 = vmatprep.subr.bf16.mxu1 %v1939_v6  ;;  %1928 = vmatprep.subr.bf16.mxu0 %v1927_v9  ;;  %v78_v17 = vld [vmem:[#allocation5 + $0x18] sm:$0xff]  ;;  %s2253_s16 = smov 72   ;;  %s2254_s17 = smov 16  }
  0x4f   :  { %1930 = vmatpush3.bf16.msra.mxu0 %v1927_v9  ;;  %s2255_s19 = smov 24   ;;  %s2256_s20 = smov [#allocation10]  }
  0x50   :  { %1932 = vmatprep.subr.bf16.mxu0 %v1931_v12  ;;  %s1676_s21 = sshll.u32 %s2256_s20, 4  ;;  %s1677_s21 = int_to_ptr.vmem [resolvable:$true] %s1676_s21 }
  0x51   :  { %1942 = vmatpush3.bf16.msra.mxu1 %v1939_v6  ;;  %s2208_s22 = scalar_lea.vmem %s1677_s21, 256  ;;  %p2213_p5 = scmp.lt.s32.totalorder %s1677_s21, %s1677_s21 }
  0x52   :  { %1947 = vmatprep.subr.bf16.mxu1 %v2244_v18  ;;  %p2209_p4 = scmp.ne.s32.totalorder %s1677_s21, %s2208_s22  ;;  %p2214_p6 = scmp.lt.s32.totalorder %s2208_s22, %s2208_s22 }
  0x53   :  { %1934 = vmatpush3.bf16.msra.mxu0 %v1931_v12 }
  0x54   :  { %1810 = vmatmul.mubr.msk.f32.vlgmr.msra.gmra.mrb[0].mxu1 %vm83_vm0, %v76_v14  ;;  %1943 = vmatprep.subr.bf16.mxu0 %v2244_v18  ;;  %p2215_p7 = por %p2214_p6, %p2213_p5 }
  0x55   :  { %1812 = vmatprep.mubr.msk.f32.mxu1 %vm83_vm0, %v77_v15 }
  0x56   :  { %1799 = vmatmul.mubr.msk.f32.vlgmr.msra.gmra.mrb[0].mxu0 %vm83_vm0, %v74_v16  ;;  %p2216_p8 = pnand %p2215_p7, %p2209_p4 }
  0x57   :  { %1819 = vmatprep.mubr.msk.f32.mxu0 %vm2245_vm1, %v2246_v19 }
  0x58   :  { %1813 = vmatmul.mubr.msk.f32.gmra.mrb[2].mxu1 %vm83_vm0, %v78_v17 }
  0x59   :  { %1826 = vmatprep.mubr.msk.f32.mxu1 %vm2245_vm1, %v2246_v19 }
 0x127   :  { %v1811_v20 = vpop.f32.mrb[0].mxu1 }
 0x128   :  { %v247_v21 = vpop.f32.mrb[1].mxu1 }
 0x129   :  { %v2374_v23 = vpack.i.bf16 %v1811_v20, %v247_v21  ;;  %v1944_v24 = vpack.c.bf16 %v1811_v20, %v247_v21  ;;  %v2376_v25 = vpop.f32.mrb[0].mxu0 }
 0x12a   :  { %v2378_v26 = vpop.f32.mrb[1].mxu0 }
 0x12b   :  { %2019 = vrot.lane.b32.xlu1 %v2374_v23, %s2247_s3  ;;  %v1814_v27 = vpop.f32.mrb[2].mxu1  ;;  %1946 = vmatpush3.bf16.xpose.msk.msra.mxu0 %vm2370_vm3, %v1944_v24 }
 0x12c   :  { %v257_v28 = vpop.f32.mrb[3].mxu1  ;;  %1951 = vmatprep.subr.bf16.mxu0 %v2244_v18 }
 0x12d   :  { %v2384_v29 = vpack.i.bf16 %v1814_v27, %v257_v28  ;;  %v1948_v30 = vpack.c.bf16 %v1814_v27, %v257_v28 }
 0x12f   :  { %2024 = vrot.lane.b32.xlu1 %v2384_v29, %s2247_s3  ;;  %1950 = vmatpush3.bf16.xpose.msk.msra.mxu1 %vm2370_vm3, %v1948_v30 }
 0x130   :  { %1954 = vmatprep.subr.bf16.mxu1 %v2244_v18 }
 0x132   :  { %1820 = vmatmul.mubr.msk.f32.vlgmr.msra.gmra.mrb[2].mxu0 %vm266_vm2, %v2378_v26 }
 0x133   :  { %2034 = vrot.lane.b32.xlu1 %v2384_v29, %s2248_s12  ;;  %1833 = vmatprep.mubr.msk.f32.mxu0 %vm2245_vm1, %v2246_v19 }
 0x136   :  { %1827 = vmatmul.mubr.msk.f32.vlgmr.msra.gmra.mrb[4].mxu1 %vm266_vm2, %v2376_v25 }
 0x137   :  { %606 = vrot.lane.b32.xlu1 %v2378_v26, %s2248_s12  ;;  %1840 = vmatprep.mubr.msk.f32.mxu1 %vm2245_vm1, %v2246_v19 }
 0x13b   :  { %688 = vrot.lane.b32.xlu1 %v2376_v25, %s2248_s12 }
 0x13f   :  { %2039 = vrot.lane.b32.xlu1 %v2374_v23, %s2249_s1 }
 0x19d   :  { %v2020_v31 = vpop.permute.xlu1 %2019 }
 0x19e   :  { %v2022_v32 = vunpack.i.h.bf16 %v2020_v31  ;;  %v2021_v33 = vunpack.i.l.bf16 %v2020_v31 }
 0x1a0   :  { %v1952_v34 = vpack.c.bf16 %v2022_v32, %v2021_v33 }
 0x1a1   :  { %v2025_v35 = vpop.permute.xlu1 %2024 }
 0x1a2   :  { %v2027_v36 = vunpack.i.h.bf16 %v2025_v35  ;;  %v2026_v37 = vunpack.i.l.bf16 %v2025_v35  ;;  %1953 = vmatpush3.bf16.msra.mxu0 %v1952_v34 }
 0x1a3   :  { %1957 = vmatprep.subr.bf16.mxu0 %v2244_v18 }
 0x1a4   :  { %v1955_v38 = vpack.c.bf16 %v2027_v36, %v2026_v37 }
 0x1a5   :  { %v2035_v45 = vpop.permute.xlu1 %2034 }
 0x1a6   :  { %1956 = vmatpush3.bf16.msra.mxu1 %v1955_v38  ;;  %v2037_v58 = vunpack.i.h.bf16 %v2035_v45  ;;  %v2036_v59 = vunpack.i.l.bf16 %v2035_v45 }
 0x1a7   :  { %1961 = vmatprep.subr.bf16.mxu1 %v2244_v18 }
 0x1a8   :  { %v1962_v63 = vpack.c.bf16 %v2037_v58, %v2036_v59 }
 0x1a9   :  { %v607_v49 = vpop.permute.xlu1 %606 }
 0x1ad   :  { %v689_v54 = vpop.permute.xlu1 %688 }
 0x1b1   :  { %v2040_v61 = vpop.permute.xlu1 %2039 }
 0x1b2   :  { %v2042_v0 = vunpack.i.h.bf16 %v2040_v61  ;;  %v2041_v1 = vunpack.i.l.bf16 %v2040_v61 }
 0x1b4   :  { %v1966_v2 = vpack.c.bf16 %v2042_v0, %v2041_v1 }
 0x205   :  { %v342_v39 = vpop.f32.mrb[2].mxu0 }
 0x206   :  { %v1821_v40 = vpop.f32.mrb[3].mxu0  ;;  %v426_v41 = vsel %vm425_vm4, %v342_v39, -inf }
 0x207   :  { %427 = vmax.xlane.f32.xlu0 %v426_v41 }
 0x209   :  { %v421_v42 = vpop.f32.mrb[4].mxu1 }
 0x20a   :  { %v1828_v43 = vpop.f32.mrb[5].mxu1  ;;  %v429_v44 = vsel %vm425_vm4, %v421_v42, -inf }
 0x20b   :  { %430 = vmax.xlane.f32.xlu0 %v429_v44 }
 0x221   :  { %2029 = vrot.lane.b32.xlu0 %v2374_v23, %s2248_s12 }
 0x294   :  { %v428_v46 = vpop.xlane.xlu0 %427 }
 0x295   :  { %v432_v47 = vsub.f32 %v342_v39, %v428_v46 }
 0x297   :  { %v434_v48 = vmul.f32 1.442695, %v432_v47 }
 0x298   :  { %v431_v50 = vpop.xlane.xlu0 %430 }
 0x299   :  { %2088 = vpow2.f32 %v434_v48  ;;  %v433_v51 = vsub.f32 %v421_v42, %v431_v50 }
 0x29b   :  { %v436_v52 = vmul.f32 1.442695, %v433_v51 }
 0x29c   :  { %v2030_v53 = vpop.permute.xlu0 %2029 }
 0x29d   :  { %2090 = vpow2.f32 %v436_v52  ;;  %v2032_v55 = vunpack.i.h.bf16 %v2030_v53  ;;  %v2031_v56 = vunpack.i.l.bf16 %v2030_v53 }
 0x29f   :  { %v1958_v60 = vpack.c.bf16 %v2032_v55, %v2031_v56 }
 0x2a3   :  { %v2408_v57 = vpop.eup %2088 }
 0x2a4   :  { %1834 = vmatmul.mubr.msk.f32.vlgmr.msra.gmra.mrb[4].mxu0 %vm425_vm4, %v2408_v57 }
 0x2a5   :  { %1960 = vmatpush3.bf16.xpose.msk.msra.mxu0 %vm2370_vm3, %v1958_v60  ;;  %1847 = vmatprep.mubr.msk.f32.mxu0 %vm2245_vm1, %v2246_v19 }
 0x2a6   :  { %1965 = vmatprep.subr.bf16.mxu0 %v2244_v18 }
 0x2a7   :  { %v2417_v62 = vpop.eup %2090 }
 0x2a8   :  { %1841 = vmatmul.mubr.msk.f32.vlgmr.msra.gmra.mrb[6].mxu1 %vm425_vm4, %v2417_v62 }
 0x2a9   :  { %1964 = vmatpush3.bf16.xpose.msk.msra.mxu1 %vm2370_vm3, %v1962_v63  ;;  %1854 = vmatprep.mubr.msk.f32.mxu1 %vm2245_vm1, %v2246_v19 }
 0x2aa   :  { %1968 = vmatprep.subr.bf16.mxu1 %v2244_v18 }
 0x2ac   :  { %1848 = vmatmul.mubr.msk.f32.vlgmr.msra.gmra.mrb[6].mxu0 %vm266_vm2, %v607_v49 }
 0x2ad   :  { %1967 = vmatpush3.bf16.msra.mxu0 %v1966_v2  ;;  %1861 = vmatprep.mubr.msk.f32.mxu0 %vm2245_vm1, %v2246_v19 }
 0x2ae   :  { %1971 = vmatprep.subr.bf16.mxu0 %v2244_v18 }
 0x2b0   :  { %1855 = vmatmul.mubr.msk.f32.vlgmr.msra.gmra.mrb[8].mxu1 %vm266_vm2, %v689_v54 }
 0x2b1   :  { %1868 = vmatprep.mubr.msk.f32.mxu1 %vm2245_vm1, %v2246_v19 }
 0x377   :  { %v2433_v3 = vpop.f32.mrb[4].mxu0 }
 0x378   :  { %v1835_v4 = vpop.f32.mrb[5].mxu0 }
 0x37b   :  { %v2435_v5 = vpop.f32.mrb[6].mxu1 }
 0x37c   :  { %v1842_v6 = vpop.f32.mrb[7].mxu1 }
 0x37f   :  { %v684_v7 = vpop.f32.mrb[6].mxu0 }
 0x380   :  { %v1849_v8 = vpop.f32.mrb[7].mxu0  ;;  %v770_v9 = vsel %vm425_vm4, %v684_v7, -inf }
 0x381   :  { %771 = vmax.xlane.f32.xlu1 %v770_v9 }
 0x383   :  { %v766_v10 = vpop.f32.mrb[8].mxu1 }
 0x384   :  { %v1856_v11 = vpop.f32.mrb[9].mxu1  ;;  %v773_v12 = vsel %vm425_vm4, %v766_v10, -inf }
 0x385   :  { %774 = vmax.xlane.f32.xlu0 %v773_v12 }
 0x392   :  { %2049 = vrot.lane.b32.xlu1 %v2374_v23, %s2250_s13 }
 0x396   :  { %2054 = vrot.lane.b32.xlu1 %v2384_v29, %s2250_s13 }
 0x39a   :  { %950 = vrot.lane.b32.xlu1 %v2378_v26, %s2250_s13 }
 0x39b   :  { %2044 = vrot.lane.b32.xlu0 %v2384_v29, %s2249_s1 }
 0x39e   :  { %2064 = vrot.lane.b32.xlu1 %v2384_v29, %s2251_s14 }
 0x39f   :  { %1032 = vrot.lane.b32.xlu0 %v2376_v25, %s2250_s13 }
 0x3a2   :  { %2069 = vrot.lane.b32.xlu1 %v2374_v23, %s2252_s15 }
 0x3a3   :  { %2059 = vrot.lane.b32.xlu0 %v2374_v23, %s2251_s14 }
 0x40e   :  { %v772_v13 = vpop.xlane.xlu1 %771 }
 0x40f   :  { %v776_v14 = vsub.f32 %v684_v7, %v772_v13 }
 0x411   :  { %v778_v15 = vmul.f32 1.442695, %v776_v14 }
 0x412   :  { %v775_v16 = vpop.xlane.xlu0 %774  ;;  %v2050_v17 = vpop.permute.xlu1 %2049 }
 0x413   :  { %2092 = vpow2.f32 %v778_v15  ;;  %v777_v20 = vsub.f32 %v766_v10, %v775_v16  ;;  %v2052_v31 = vunpack.i.h.bf16 %v2050_v17  ;;  %v2051_v32 = vunpack.i.l.bf16 %v2050_v17 }
 0x415   :  { %v780_v21 = vmul.f32 1.442695, %v777_v20  ;;  %v1972_v36 = vpack.c.bf16 %v2052_v31, %v2051_v32 }
 0x416   :  { %v2045_v24 = vpop.permute.xlu0 %2044  ;;  %v2055_v30 = vpop.permute.xlu1 %2054 }
 0x417   :  { %2094 = vpow2.f32 %v780_v21  ;;  %v2047_v27 = vunpack.i.h.bf16 %v2045_v24  ;;  %v2046_v28 = vunpack.i.l.bf16 %v2045_v24  ;;  %v2057_v38 = vunpack.i.h.bf16 %v2055_v30 }
 0x418   :  { %v2056_v39 = vunpack.i.l.bf16 %v2055_v30 }
 0x419   :  { %v1969_v33 = vpack.c.bf16 %v2047_v27, %v2046_v28 }
 0x41a   :  { %v1033_v34 = vpop.permute.xlu0 %1032  ;;  %v951_v37 = vpop.permute.xlu1 %950  ;;  %v1976_v44 = vpack.c.bf16 %v2057_v38, %v2056_v39 }
 0x41b   :  { %1970 = vmatpush3.bf16.msra.mxu1 %v1969_v33 }
 0x41c   :  { %1975 = vmatprep.subr.bf16.mxu1 %v2244_v18 }
 0x41d   :  { %v2450_v35 = vpop.eup %2092 }
 0x41e   :  { %v2060_v40 = vpop.permute.xlu0 %2059  ;;  %1862 = vmatmul.mubr.msk.f32.vlgmr.msra.gmra.mrb[8].mxu0 %vm425_vm4, %v2450_v35  ;;  %v2065_v45 = vpop.permute.xlu1 %2064 }
 0x41f   :  { %1974 = vmatpush3.bf16.xpose.msk.msra.mxu0 %vm2370_vm3, %v1972_v36  ;;  %1875 = vmatprep.mubr.msk.f32.mxu0 %vm2245_vm1, %v2246_v19  ;;  %v2062_v42 = vunpack.i.h.bf16 %v2060_v40  ;;  %v2061_v43 = vunpack.i.l.bf16 %v2060_v40  ;;  %v2067_v47 = vunpack.i.h.bf16 %v2065_v45  ;;  %v2066_v48 = vunpack.i.l.bf16 %v2065_v45 }
 0x420   :  { %1979 = vmatprep.subr.bf16.mxu0 %v2244_v18 }
 0x421   :  { %v2459_v41 = vpop.eup %2094  ;;  %v1980_v46 = vpack.c.bf16 %v2062_v42, %v2061_v43  ;;  %v1983_v49 = vpack.c.bf16 %v2067_v47, %v2066_v48 }
 0x422   :  { %1869 = vmatmul.mubr.msk.f32.vlgmr.msra.gmra.mrb[10].mxu1 %vm425_vm4, %v2459_v41  ;;  %v2070_v61 = vpop.permute.xlu1 %2069  ;;  %v785_v32 = vsel %vm425_vm4, %v2459_v41, 0.0 }
 0x423   :  { %1882 = vmatprep.mubr.msk.f32.mxu1 %vm2245_vm1, %v2246_v19  ;;  %v2072_v7 = vunpack.i.h.bf16 %v2070_v61  ;;  %v2071_v8 = vunpack.i.l.bf16 %v2070_v61 }
 0x424   :  { %1978 = vmatpush3.bf16.xpose.msk.msra.mxu1 %vm2370_vm3, %v1976_v44 }
 0x425   :  { %1982 = vmatprep.subr.bf16.mxu1 %v2244_v18 }
 0x426   :  { %1876 = vmatmul.mubr.msk.f32.vlgmr.msra.gmra.mrb[10].mxu0 %vm266_vm2, %v951_v37 }
 0x427   :  { %1981 = vmatpush3.bf16.msra.mxu0 %v1980_v46  ;;  %1889 = vmatprep.mubr.msk.f32.mxu0 %vm2245_vm1, %v2246_v19 }
 0x428   :  { %1985 = vmatprep.subr.bf16.mxu0 %v2244_v18 }
 0x42b   :  { %1883 = vmatmul.mubr.msk.f32.vlgmr.msra.gmra.mrb[12].mxu1 %vm266_vm2, %v1033_v34 }
 0x42c   :  { %1984 = vmatpush3.bf16.msra.mxu1 %v1983_v49  ;;  %1896 = vmatprep.mubr.msk.f32.mxu1 %vm2245_vm1, %v2246_v19  ;;  %v438_v49 = vsel %vm425_vm4, %v2408_v57, 0.0 }
 0x42d   :  { %1989 = vmatprep.subr.bf16.mxu1 %v2244_v18 }
 0x4f1   :  { %v2476_v50 = vpop.f32.mrb[8].mxu0 }
 0x4f2   :  { %v1863_v51 = vpop.f32.mrb[9].mxu0 }
 0x4f5   :  { %v2478_v52 = vpop.f32.mrb[10].mxu1 }
 0x4f6   :  { %v1870_v53 = vpop.f32.mrb[11].mxu1 }
 0x4f7   :  { %v441_v53 = vsel %vm425_vm4, %v2417_v62, 0.0 }
 0x4f9   :  { %v1028_v54 = vpop.f32.mrb[10].mxu0 }
 0x4fa   :  { %v1877_v55 = vpop.f32.mrb[11].mxu0  ;;  %v1114_v56 = vsel %vm425_vm4, %v1028_v54, -inf }
 0x4fb   :  { %1115 = vmax.xlane.f32.xlu1 %v1114_v56 }
 0x4fe   :  { %v1110_v58 = vpop.f32.mrb[12].mxu1 }
 0x4ff   :  { %v1884_v59 = vpop.f32.mrb[13].mxu1  ;;  %v1117_v60 = vsel %vm425_vm4, %v1110_v58, -inf }
 0x500   :  { %1118 = vmax.xlane.f32.xlu0 %v1117_v60 }
 0x50c   :  { %1294 = vrot.lane.b32.xlu1 %v2378_v26, %s2252_s15  ;;  %v1986_v26 = vpack.c.bf16 %v2072_v7, %v2071_v8 }
 0x516   :  { %2074 = vrot.lane.b32.xlu0 %v2384_v29, %s2252_s15 }
 0x51a   :  { %1376 = vrot.lane.b32.xlu0 %v2376_v25, %s2252_s15 }
 0x588   :  { %v1116_v63 = vpop.xlane.xlu1 %1115 }
 0x589   :  { %v1120_v0 = vsub.f32 %v1028_v54, %v1116_v63 }
 0x58b   :  { %v1122_v1 = vmul.f32 1.442695, %v1120_v0 }
 0x58c   :  { %v1295_v14 = vpop.permute.xlu1 %1294 }
 0x58d   :  { %2096 = vpow2.f32 %v1122_v1  ;;  %v1119_v2 = vpop.xlane.xlu0 %1118 }
 0x58e   :  { %v1121_v4 = vsub.f32 %v1110_v58, %v1119_v2 }
 0x590   :  { %v1124_v6 = vmul.f32 1.442695, %v1121_v4 }
 0x591   :  { %v2075_v9 = vpop.permute.xlu0 %2074 }
 0x592   :  { %2098 = vpow2.f32 %v1124_v6  ;;  %v2077_v11 = vunpack.i.h.bf16 %v2075_v9  ;;  %v2076_v12 = vunpack.i.l.bf16 %v2075_v9 }
 0x594   :  { %v1990_v13 = vpack.c.bf16 %v2077_v11, %v2076_v12 }
 0x595   :  { %v1377_v15 = vpop.permute.xlu0 %1376 }
 0x597   :  { %v2097_v10 = vpop.eup %2096 }
 0x598   :  { %1890 = vmatmul.mubr.msk.f32.vlgmr.msra.gmra.mrb[12].mxu0 %vm425_vm4, %v2097_v10  ;;  %v1126_v33 = vsel %vm425_vm4, %v2097_v10, 0.0 }
 0x599   :  { %1988 = vmatpush3.bf16.xpose.msk.msra.mxu0 %vm2370_vm3, %v1986_v26  ;;  %1903 = vmatprep.mubr.msk.f32.mxu0 %vm2245_vm1, %v2246_v19 }
 0x59a   :  { %1993 = vmatprep.subr.bf16.mxu0 %v2244_v18 }
 0x59c   :  { %v2099_v25 = vpop.eup %2098 }
 0x59d   :  { %1897 = vmatmul.mubr.msk.f32.vlgmr.msra.gmra.mrb[14].mxu1 %vm425_vm4, %v2099_v25  ;;  %v1129_v31 = vsel %vm425_vm4, %v2099_v25, 0.0 }
 0x59e   :  { %1992 = vmatpush3.bf16.xpose.msk.msra.mxu1 %vm2370_vm3, %v1990_v13  ;;  %1910 = vmatprep.mubr.msk.f32.mxu1 %vm2245_vm1, %v2246_v19 }
 0x59f   :  { %1996 = vmatprep.subr.bf16.mxu1 %v2244_v18 }
 0x5a0   :  { %1904 = vmatmul.mubr.msk.f32.vlgmr.msra.gmra.mrb[14].mxu0 %vm266_vm2, %v1295_v14 }
 0x5a1   :  { %1917 = vmatprep.mubr.msk.f32.mxu0 %vm2245_vm1, %v2246_v19 }
 0x5a5   :  { %1911 = vmatmul.mubr.msk.f32.vlgmr.msra.gmra.mrb[16].mxu1 %vm266_vm2, %v1377_v15 }
 0x5a6   :  { %1924 = vmatprep.mubr.msk.f32.mxu1 %vm2245_vm1, %v2246_v19  ;;  %v782_v19 = vsel %vm425_vm4, %v2450_v35, 0.0 }
 0x66b   :  { %v2506_v16 = vpop.f32.mrb[12].mxu0 }
 0x66c   :  { %v1891_v22 = vpop.f32.mrb[13].mxu0 }
 0x670   :  { %v2508_v17 = vpop.f32.mrb[14].mxu1 }
 0x671   :  { %v1898_v20 = vpop.f32.mrb[15].mxu1 }
 0x673   :  { %v1372_v21 = vpop.f32.mrb[14].mxu0 }
 0x674   :  { %v1905_v24 = vpop.f32.mrb[15].mxu0  ;;  %v1458_v18 = vsel %vm425_vm4, %v1372_v21, -inf }
 0x675   :  { %1459 = vmax.xlane.f32.xlu1 %v1458_v18 }
 0x678   :  { %v1454_v27 = vpop.f32.mrb[16].mxu1 }
 0x679   :  { %v1912_v28 = vpop.f32.mrb[17].mxu1  ;;  %v1461_v30 = vsel %vm425_vm4, %v1454_v27, -inf }
 0x67a   :  { %1462 = vmax.xlane.f32.xlu0 %v1461_v30 }
 0x686   :  { %2084 = vrot.lane.b32.xlu1 %v2384_v29, %s2253_s16 }
 0x690   :  { %2079 = vrot.lane.b32.xlu0 %v2374_v23, %s2253_s16 }
 0x6aa   :  { %783 = vadd.xlane.f32.xlu1 %v782_v19 }
 0x6ae   :  { %1130 = vadd.xlane.f32.xlu1 %v1129_v31 }
 0x6af   :  { %786 = vadd.xlane.f32.xlu0 %v785_v32 }
 0x6b3   :  { %1127 = vadd.xlane.f32.xlu0 %v1126_v33 }
 0x702   :  { %v1460_v34 = vpop.xlane.xlu1 %1459 }
 0x703   :  { %v1464_v36 = vsub.f32 %v1372_v21, %v1460_v34 }
 0x705   :  { %v1466_v37 = vmul.f32 1.442695, %v1464_v36 }
 0x706   :  { %v2085_v29 = vpop.permute.xlu1 %2084 }
 0x707   :  { %2100 = vpow2.f32 %v1466_v37  ;;  %v2087_v23 = vunpack.i.h.bf16 %v2085_v29  ;;  %v2086_v38 = vunpack.i.l.bf16 %v2085_v29  ;;  %v1463_v39 = vpop.xlane.xlu0 %1462 }
 0x708   :  { %v1465_v35 = vsub.f32 %v1454_v27, %v1463_v39 }
 0x709   :  { %v1997_v40 = vpack.c.bf16 %v2087_v23, %v2086_v38 }
 0x70a   :  { %v1468_v42 = vmul.f32 1.442695, %v1465_v35 }
 0x70b   :  { %1998 = vmatpush3.bf16.msra.mxu1 %v1997_v40  ;;  %v2080_v43 = vpop.permute.xlu0 %2079 }
 0x70c   :  { %2102 = vpow2.f32 %v1468_v42  ;;  %v2082_v44 = vunpack.i.h.bf16 %v2080_v43  ;;  %v2081_v41 = vunpack.i.l.bf16 %v2080_v43 }
 0x70e   :  { %v1994_v45 = vpack.c.bf16 %v2082_v44, %v2081_v41 }
 0x710   :  { %1995 = vmatpush3.bf16.msra.mxu0 %v1994_v45 }
 0x711   :  { %v2101_v46 = vpop.eup %2100 }
 0x712   :  { %v1470_v47 = vsel %vm425_vm4, %v2101_v46, 0.0 }
 0x713   :  { %1471 = vadd.xlane.f32.xlu0 %v1470_v47  ;;  %1918 = vmatmul.mubr.msk.f32.vlgmr.msra.gmra.mrb[16].mxu0 %vm425_vm4, %v2101_v46 }
 0x716   :  { %v2103_v48 = vpop.eup %2102 }
 0x717   :  { %439 = vadd.xlane.f32.xlu0 %v438_v49  ;;  %1925 = vmatmul.mubr.msk.f32.vlgmr.msra.gmra.mrb[18].mxu1 %vm425_vm4, %v2103_v48  ;;  %v1473_v51 = vsel %vm425_vm4, %v2103_v48, 0.0 }
 0x718   :  { %1474 = vadd.xlane.f32.xlu1 %v1473_v51 }
 0x71c   :  { %442 = vadd.xlane.f32.xlu1 %v441_v53 }
 0x737   :  { %v784_v54 = vpop.xlane.xlu1 %783 }
 0x738   :  { %2104 = vrcp.f32 %v784_v54 }
 0x73b   :  { %v1131_v55 = vpop.xlane.xlu1 %1130 }
 0x73c   :  { %2106 = vrcp.f32 %v1131_v55  ;;  %v787_v56 = vpop.xlane.xlu0 %786 }
 0x73d   :  { %2108 = vrcp.f32 %v787_v56 }
 0x740   :  { %v1128_v58 = vpop.xlane.xlu0 %1127 }
 0x741   :  { %2110 = vrcp.f32 %v1128_v58 }
 0x742   :  { %v2105_v59 = vpop.eup %2104 }
 0x743   :  { %v948_v57 = vmul.f32 %v2105_v59, %v2476_v50 }
 0x745   :  { %1640 = vrot.lane.b32.xlu0 %v948_v57, %s2241_s28 }
 0x746   :  { %v2107_v60 = vpop.eup %2106 }
 0x747   :  { %v2109_v61 = vpop.eup %2108  ;;  %v1293_v63 = vmul.f32 %v2107_v60, %v2508_v17 }
 0x748   :  { %v949_v62 = vmul.f32 %v2109_v61, %v2478_v52 }
 0x749   :  { %1650 = vrot.lane.b32.xlu0 %v1293_v63, %s2254_s17 }
 0x74a   :  { %1642 = vrot.lane.b32.xlu1 %v949_v62, %s2241_s28 }
 0x74b   :  { %v2111_v0 = vpop.eup %2110 }
 0x74c   :  { %v1292_v1 = vmul.f32 %v2111_v0, %v2506_v16 }
 0x74e   :  { %1648 = vrot.lane.b32.xlu1 %v1292_v1, %s2254_s17 }
 0x7a0   :  { %v1472_v2 = vpop.xlane.xlu0 %1471 }
 0x7a1   :  { %2112 = vrcp.f32 %v1472_v2 }
 0x7a4   :  { %v440_v11 = vpop.xlane.xlu0 %439 }
 0x7a5   :  { %v1475_v4 = vpop.xlane.xlu1 %1474 }
 0x7a6   :  { %2114 = vrcp.f32 %v1475_v4 }
 0x7a7   :  { %2116 = vrcp.f32 %v440_v11 }
 0x7a9   :  { %v443_v12 = vpop.xlane.xlu1 %442 }
 0x7aa   :  { %2118 = vrcp.f32 %v443_v12 }
 0x7ab   :  { %v2113_v50 = vpop.eup %2112 }
 0x7b0   :  { %v2115_v9 = vpop.eup %2114 }
 0x7b1   :  { %v2117_v13 = vpop.eup %2116 }
 0x7b2   :  { %v604_v22 = vmul.f32 %v2117_v13, %v2433_v3 }
 0x7b4   :  { %v2119_v15 = vpop.eup %2118 }
 0x7b5   :  { %v605_v20 = vmul.f32 %v2119_v15, %v2435_v5 }
 0x7b7   :  { %v1641_v14 = vpop.permute.xlu0 %1640 }
 0x7b8   :  { %v1662_v17 = vsel %vm266_vm2, %v604_v22, %v1641_v14 }
 0x7bb   :  { %v1651_v21 = vpop.permute.xlu0 %1650 }
 0x7bc   :  { %v1643_v25 = vpop.permute.xlu1 %1642 }
 0x7bd   :  { %v1663_v27 = vsel %vm266_vm2, %v605_v20, %v1643_v25 }
 0x7be   :  { %v1665_v30 = vsel %vm425_vm4, %v1663_v27, %v1651_v21 }
 0x7c0   :  { %v1649_v16 = vpop.permute.xlu1 %1648 }
 0x7c1   :  { %v1664_v24 = vsel %vm425_vm4, %v1662_v17, %v1649_v16 }
 0x7e6   :  { %v1551_v6 = vpop.f32.mrb[16].mxu0 }
 0x7e7   :  { %v1636_v7 = vmul.f32 %v2113_v50, %v1551_v6  ;;  %v1919_v8 = vpop.f32.mrb[17].mxu0 }
 0x7e9   :  { %1656 = vrot.lane.b32.xlu1 %v1636_v7, %s2255_s19 }
 0x7ea   :  { %v1630_v52 = vpop.f32.mrb[18].mxu1 }
 0x7eb   :  { %v1637_v10 = vmul.f32 %v2115_v9, %v1630_v52  ;;  %v1926_v26 = vpop.f32.mrb[19].mxu1 }
 0x7ed   :  { %1658 = vrot.lane.b32.xlu0 %v1637_v10, %s2255_s19 }
 0x85b   :  { %v1657_v18 = vpop.permute.xlu1 %1656 }
 0x85c   :  { %v1667_v28 = vsel %vm1666_vm5, %v1664_v24, %v1657_v18 }
 0x85d   :  { %1669 = vst.msk [vmem:[#allocation10] sm:$0xff] %vm83_vm0, %v1667_v28 }
 0x85f   :  { %v1659_v19 = vpop.permute.xlu0 %1658 }
 0x860   :  { %v1668_v3 = vsel %vm1666_vm5, %v1665_v30, %v1659_v19 }
 0x861   :  { %1670 = vst.msk [vmem:[#allocation10 + $0x8] sm:$0xff] %vm83_vm0, %v1668_v3 }
 0x862   :  { %2219 = shalt.err (!%p2216_p8)
}
 0x863   :  { %s2220_s25 = scalar_lea.hbm %s2561_s4, 256 }
 0x864   :  { %p2221_p9 = scmp.ne.s32.totalorder %s2561_s4, %s2220_s25  ;;  %p2224_p10 = scmp.lt.u32.totalorder %s2220_s25, %s2561_s4 }
 0x866   :  { %p2226_p11 = pnand %p2224_p10, %p2221_p9 }
 0x868   :  { %2229 = shalt.err (!%p2226_p11)
}
 0x869   :  { %1682 = dma.vmem_to_hbm [thread:$0]  %s1677_s21, 256, %s2561_s4, [#allocation4], %s2240_s27, %s2240_s27, %s2241_s28  }
 0x86a   :  { %2236 = dma.done.wait [#allocation4], 256  }
 0x86b   :  { %2237 = vsyncadd [#allocation4], 4294967040 }
 0x86c   :  { %1686 = vsyncpa [#allocation3], 1 }
 0x86d   :  { %1687 = vsyncpa [#allocation6], 1 }
 0x86e   :  { %1688 = vsyncpa [#allocation9], 1 }
 0x86f   :  { %1689 = vsyncpa [#allocation4], 1 }

</bundles_post_ra>
